<compile_context>
chip_gen: v6e
topology: v6e:2x2x1
jax: 0.10.0
libtpu: 0.0.40
codegen_flags: <defaults>
</compile_context>

<pallas_src>
import functools

import jax
import jax.numpy as jnp
from jax.experimental import pallas as pl
from jax.experimental.pallas import tpu as pltpu


def _dkd_kernel(ls_ref, lt_ref, tgt_ref, out_ref, *,
                inv_t, coef_tckd, coef_nckd, batch):
    c = pl.program_id(0)          # core split axis ("parallel")
    t = pl.program_id(1)          # batch-tile axis ("arbitrary", accumulated)

    @pl.when(t == 0)
    def _init():
        out_ref[...] = jnp.zeros_like(out_ref)

    tb, num_c = ls_ref.shape

    # Row validity, from the UNclamped logical tile index (handles the ragged
    # last tile and any duplicated, index-map-clamped tiles alike).
    tile_idx = c * pl.num_programs(1) + t
    row_ids = jax.lax.broadcasted_iota(jnp.int32, (tb, 1), 0)
    global_row = tile_idx * tb + row_ids
    valid_b = global_row < batch                         # (tb, 1) bool

    # Neutralize out-of-range rows BEFORE exp/log: OOB block reads are
    # unspecified, and Inf*0 -> NaN would otherwise leak into the accumulator.
    ls = jnp.where(valid_b, ls_ref[...].astype(jnp.float32), 0.0)
    lt = jnp.where(valid_b, lt_ref[...].astype(jnp.float32), 0.0)
    tgt = jnp.where(valid_b, tgt_ref[...], 0)            # (tb, 1) int32

    # gt-class mask via class-index iota == target (replaces torch scatter_).
    cls_ids = jax.lax.broadcasted_iota(jnp.int32, (tb, num_c), 1)
    is_gt = cls_ids == tgt                               # (tb, C) bool

    # ---- single exp pass per tensor; temperature folded into exp arg ------
    m_s = jnp.max(ls, axis=1, keepdims=True)
    m_t = jnp.max(lt, axis=1, keepdims=True)
    ds = (ls - m_s) * inv_t
    dt = (lt - m_t) * inv_t
    e_s = jnp.exp(ds)
    e_t = jnp.exp(dt)

    # Masked reductions via where-selects (no materialized float masks).
    e_s_gt = jnp.sum(jnp.where(is_gt, e_s, 0.0), axis=1, keepdims=True)  # (tb,1)
    e_t_gt = jnp.sum(jnp.where(is_gt, e_t, 0.0), axis=1, keepdims=True)
    z_s = jnp.sum(jnp.where(is_gt, 0.0, e_s), axis=1, keepdims=True)     # non-target sum
    z_t = jnp.sum(jnp.where(is_gt, 0.0, e_t), axis=1, keepdims=True)
    s_s = z_s + e_s_gt                                                   # full exp-sum
    s_t = z_t + e_t_gt

    # ---- TCKD: KL between 2-bin (target vs non-target) distributions ------
    # All quantities are (tb,1); no normalized (tb,C) tensors are needed.
    ps1 = e_s_gt / s_s
    pt1 = e_t_gt / s_t
    ps2 = z_s / s_s
    pt2 = z_t / s_t
    # NOTE: pt1*log(pt1) can NaN if the teacher puts ~0 mass on the gt class
    # (f32 exp underflow); the PyTorch reference has the same hazard.
    tckd_rows = (pt1 * (jnp.log(pt1) - jnp.log(ps1)) +
                 pt2 * (jnp.log(pt2) - jnp.log(ps2)))

    # ---- NCKD: KL over non-target classes (gt class excluded exactly) -----
    #   sum_{j!=gt} pt2_j * (log pt2_j - log ps2_j)
    # = (1/z_t) * sum_{j!=gt} e_t_j * (dt_j - ds_j) + log(z_s) - log(z_t)
    nckd_rows = (jnp.sum(jnp.where(is_gt, 0.0, e_t * (dt - ds)),
                         axis=1, keepdims=True) / z_t
                 + (jnp.log(z_s) - jnp.log(z_t)))

    partial = (coef_tckd * jnp.sum(jnp.where(valid_b, tckd_rows, 0.0)) +
               coef_nckd * jnp.sum(jnp.where(valid_b, nckd_rows, 0.0)))
    out_ref[...] = out_ref[...] + partial


def _round_up(x, m):
    return ((x + m - 1) // m) * m


def _round_down8(x):
    return max(8, (int(x) // 8) * 8)


def _vmem_capacity_bytes():
    """Per-core VMEM capacity; conservative (v7x) fallback if query fails."""
    try:
        cap = int(pltpu.get_tpu_info().vmem_capacity_bytes)
        if cap > 0:
            return cap
    except Exception:  # pragma: no cover
        pass
    return 64 * 1024 * 1024


def _default_num_cores():
    """Best-effort TensorCores-per-chip (2 on v7x, 1 on v5e/v6e)."""
    try:
        dev = jax.devices()[0]
        for attr in ("num_cores", "core_count"):
            v = getattr(dev, attr, None)
            if v:
                return max(1, int(v))
    except Exception:  # pragma: no cover
        pass
    try:
        info = pltpu.get_tpu_info()
        for attr in ("num_cores", "tensorcore_count", "cores_per_chip"):
            v = getattr(info, attr, None)
            if v:
                return max(1, int(v))
    except Exception:  # pragma: no cover
        pass
    return 1


def dkd_loss_pallas(y_s, y_t, target, epoch,
                    alpha=1.0, beta=2.0, temperature=4.0, warmup=20,
                    num_cores=None, block_b=None):
    B, C = y_s.shape
    # NOTE: Python-level min; epoch must be a static Python number (as in the
    # PyTorch module). A traced epoch would need jnp.minimum in the wrapper.
    warm = min(float(epoch) / float(warmup), 1.0)
    scale = float(temperature) ** 2 / float(B)
    coef_tckd = warm * float(alpha) * scale
    coef_nckd = warm * float(beta) * scale

    # ---- generation-aware VMEM budget & batch tile size --------------------
    vmem_cap = _vmem_capacity_bytes()
    # ~3/4 of physical per-core VMEM: ~48 MiB on v7x (64), ~96 MiB on v5e/v6e (128).
    vmem_limit = int(min(vmem_cap * 3 // 4, 96 * 1024 * 1024))

    itemsize = jnp.dtype(y_s.dtype).itemsize
    if num_cores is None:
        num_cores = _default_num_cores()
    num_cores = max(1, int(num_cores))

    if block_b is None:
        # Per-row footprint: 2 input tensors x 2 pipeline buffers (input dtype)
        # + ~10 live f32 (tb, C) intermediates in the kernel body.
        k_temps = 10
        bytes_per_row = 4 * C * itemsize + k_temps * C * 4
        # Tile budget capped so the same sizing fits v7x's 64 MiB VMEM; >=512
        # row tiles (the HBM-roofline plateau) are still reachable on v5e/v6e.
        budget = min(int(vmem_limit * 0.9), 44 * 1024 * 1024)
        tb = budget // max(bytes_per_row, 1)
        tb = min(tb, 2048, _round_up(B, 8))
        tb = _round_down8(tb)
        # Guarantee both TensorCores get work on multi-TC parts (per-step
        # overhead is only ~0.35 us, so smaller tiles per core are cheap).
        if num_cores > 1 and B > 8 * num_cores:
            tb = min(tb, _round_down8(pl.cdiv(B, 2 * num_cores)))
        tb = max(8, tb)
    else:
        tb = _round_down8(block_b)

    tiles_total = pl.cdiv(B, tb)
    num_cores = max(1, min(num_cores, tiles_total))
    tiles_per_core = pl.cdiv(tiles_total, num_cores)
    last_tile = tiles_total - 1

    tgt = target.reshape(B, 1).astype(jnp.int32)

    kernel = functools.partial(
        _dkd_kernel,
        inv_t=1.0 / float(temperature),
        coef_tckd=coef_tckd,
        coef_nckd=coef_nckd,
        batch=int(B),
    )

    # Clamp the block index so the DMA never targets a fully out-of-range
    # block; the kernel's row-validity mask (from the unclamped tile index)
    # makes any duplicated tile contribute exactly zero.
    def block_map(c, t):
        return (jnp.minimum(c * tiles_per_core + t, last_tile), 0)

    logits_spec = pl.BlockSpec((tb, C), block_map)
    tgt_spec = pl.BlockSpec((tb, 1), block_map)
    # Lane-dense per-core partials: one 128-lane block per core, accumulated
    # across the trailing "arbitrary" axis, summed in the wrapper.
    out_spec = pl.BlockSpec((1, 128), lambda c, t: (0, c))

    out = pl.pallas_call(
        kernel,
        out_shape=jax.ShapeDtypeStruct((1, 128 * num_cores), jnp.float32),
        grid_spec=pltpu.PrefetchScalarGridSpec(
            num_scalar_prefetch=0,
            grid=(num_cores, tiles_per_core),
            in_specs=[logits_spec, logits_spec, tgt_spec],
            out_specs=out_spec,
        ),
        compiler_params=pltpu.CompilerParams(
            dimension_semantics=("parallel", "arbitrary"),
            vmem_limit_bytes=vmem_limit,
        ),
    )(y_s, y_t, tgt)

    return jnp.sum(out.reshape(num_cores, 128)[:, 0])


def _dkd_loss_ref(y_s, y_t, target, epoch,
                  alpha=1.0, beta=2.0, temperature=4.0, warmup=20):
    """Pure-JAX reference mirroring the PyTorch code (for verification)."""
    B, C = y_s.shape
    gt = jax.nn.one_hot(target, C, dtype=jnp.float32)
    other = 1.0 - gt
    ps = jax.nn.softmax(y_s / temperature, axis=1)
    pt = jax.nn.softmax(y_t / temperature, axis=1)
    ps_cat = jnp.concatenate([(ps * gt).sum(1, keepdims=True),
                              (ps * other).sum(1, keepdims=True)], axis=1)
    pt_cat = jnp.concatenate([(pt * gt).sum(1, keepdims=True),
                              (pt * other).sum(1, keepdims=True)], axis=1)
    tckd = jnp.sum(pt_cat * (jnp.log(pt_cat) - jnp.log(ps_cat)))
    lt_m = y_t / temperature - 1000.0 * gt
    ls_m = y_s / temperature - 1000.0 * gt
    log_pt2 = jax.nn.log_softmax(lt_m, axis=1)
    log_ps2 = jax.nn.log_softmax(ls_m, axis=1)
    pt2 = jnp.exp(log_pt2)
    nckd = jnp.sum(pt2 * (log_pt2 - log_ps2))
    scale = temperature ** 2 / B
    return min(epoch / warmup, 1.0) * (alpha * tckd * scale + beta * nckd * scale)


if __name__ == "__main__":
    key = jax.random.PRNGKey(0)
    k1, k2, k3 = jax.random.split(key, 3)

    # Case 1: small aligned shapes (batch=8, classes=32), epoch 5 -> warm 0.25.
    B, C = 8, 32
    y_s = jax.random.normal(k1, (B, C), dtype=jnp.float32)
    y_t = jax.random.normal(k2, (B, C), dtype=jnp.float32)
    target = jax.random.randint(k3, (B,), 0, C, dtype=jnp.int32)
    loss = jax.block_until_ready(
        dkd_loss_pallas(y_s, y_t, target, 5, alpha=1.0, beta=2.0,
                        temperature=4.0, warmup=20))
    ref = _dkd_loss_ref(y_s, y_t, target, 5, alpha=1.0, beta=2.0,
                        temperature=4.0, warmup=20)
    assert jnp.allclose(loss, ref, rtol=1e-4, atol=1e-5), (loss, ref)

    # Case 2: non-multiple-of-8 batch + odd class count + forced small tile
    # -> exercises the un-padded ragged last block and in-kernel row masking;
    # epoch past warmup (warm = 1.0).
    k4, k5, k6 = jax.random.split(jax.random.PRNGKey(1), 3)
    B2, C2 = 12, 40
    y_s2 = jax.random.normal(k4, (B2, C2), dtype=jnp.float32)
    y_t2 = jax.random.normal(k5, (B2, C2), dtype=jnp.float32)
    target2 = jax.random.randint(k6, (B2,), 0, C2, dtype=jnp.int32)
    loss2 = jax.block_until_ready(
        dkd_loss_pallas(y_s2, y_t2, target2, 25, block_b=8))
    ref2 = _dkd_loss_ref(y_s2, y_t2, target2, 25)
    assert jnp.allclose(loss2, ref2, rtol=1e-4, atol=1e-5), (loss2, ref2)

    # Case 3: forced 2-core split with an odd tile count (3 tiles over 2 cores)
    # -> exercises the clamped duplicate tile + per-core partial accumulation.
    k7, k8, k9 = jax.random.split(jax.random.PRNGKey(2), 3)
    B3, C3 = 24, 32
    y_s3 = jax.random.normal(k7, (B3, C3), dtype=jnp.float32)
    y_t3 = jax.random.normal(k8, (B3, C3), dtype=jnp.float32)
    target3 = jax.random.randint(k9, (B3,), 0, C3, dtype=jnp.int32)
    loss3 = jax.block_until_ready(
        dkd_loss_pallas(y_s3, y_t3, target3, 10, num_cores=2, block_b=8))
    ref3 = _dkd_loss_ref(y_s3, y_t3, target3, 10)
    assert jnp.allclose(loss3, ref3, rtol=1e-4, atol=1e-5), (loss3, ref3)

    print("KERNEL_OK")
</pallas_src>

<mosaic_0001>
module attributes {stable_mosaic.version = 11 : i64} {
  func.func @_dkd_kernel(%arg0: i32, %arg1: i32, %arg2: memref<8x32xf32, #tpu.memory_space<vmem>>, %arg3: memref<8x32xf32, #tpu.memory_space<vmem>>, %arg4: memref<8x1xi32, #tpu.memory_space<vmem>>, %arg5: memref<1x128xf32, #tpu.memory_space<vmem>>) attributes {dimension_semantics = [#tpu.dimension_semantics<parallel>, #tpu.dimension_semantics<arbitrary>], iteration_bounds = array<i64: 1, 1>, scalar_prefetch = 0 : i64, scratch_operands = 0 : i64, tpu.core_type = #tpu.core_type<tc>, window_params = [{transform_indices = @transform_0, window_bounds = array<i64: 8, 32>}, {transform_indices = @transform_1, window_bounds = array<i64: 8, 32>}, {transform_indices = @transform_2, window_bounds = array<i64: 8, 1>}, {transform_indices = @transform_3, window_bounds = array<i64: 1, 128>}]} {
    %c0_i32 = arith.constant 0 : i32
    %0 = arith.cmpi eq, %arg1, %c0_i32 : i32
    %1 = arith.extui %0 : i1 to i32
    %c0_i32_0 = arith.constant 0 : i32
    %2 = arith.cmpi ne, %1, %c0_i32_0 : i32
    scf.if %2 {
      %cst_33 = arith.constant 0.000000e+00 : f32
      %102 = vector.broadcast %cst_33 : f32 to vector<1x128xf32>
      %c0_34 = arith.constant 0 : index
      %c0_35 = arith.constant 0 : index
      %103 = vector.load %arg5[%c0_34, %c0_35] : memref<1x128xf32, #tpu.memory_space<vmem>>, vector<1x128xf32>
      tpu.vector_store %arg5[%c0_34, %c0_35], %102 {strides = array<i32>} : memref<1x128xf32, #tpu.memory_space<vmem>>, vector<1x128xf32>,
    } else {
    }
    %c1_i32 = arith.constant 1 : i32
    %3 = arith.muli %arg0, %c1_i32 : i32
    %4 = arith.addi %3, %arg1 : i32
    %5 = tpu.iota {dimensions = array<i32: 0>} : vector<8x1xi32>
    %c8_i32 = arith.constant 8 : i32
    %6 = arith.muli %4, %c8_i32 : i32
    %7 = vector.broadcast %6 : i32 to vector<8x1xi32>
    %8 = arith.addi %7, %5 : vector<8x1xi32>
    %c8_i32_1 = arith.constant 8 : i32
    %9 = vector.broadcast %c8_i32_1 : i32 to vector<8x1xi32>
    %10 = arith.cmpi slt, %8, %9 : vector<8x1xi32>
    %c0 = arith.constant 0 : index
    %c0_2 = arith.constant 0 : index
    %11 = vector.load %arg2[%c0, %c0_2] : memref<8x32xf32, #tpu.memory_space<vmem>>, vector<8x32xf32>
    %cst = arith.constant 0.000000e+00 : f32
    %12 = vector.shape_cast %10 : vector<8x1xi1> to vector<8x1xi1>
    %13 = vector.broadcast %12 : vector<8x1xi1> to vector<8x32xi1>
    %14 = vector.broadcast %cst : f32 to vector<8x32xf32>
    %15 = arith.select %13, %11, %14 : vector<8x32xi1>, vector<8x32xf32>
    %c0_3 = arith.constant 0 : index
    %c0_4 = arith.constant 0 : index
    %16 = vector.load %arg3[%c0_3, %c0_4] : memref<8x32xf32, #tpu.memory_space<vmem>>, vector<8x32xf32>
    %cst_5 = arith.constant 0.000000e+00 : f32
    %17 = vector.shape_cast %10 : vector<8x1xi1> to vector<8x1xi1>
    %18 = vector.broadcast %17 : vector<8x1xi1> to vector<8x32xi1>
    %19 = vector.broadcast %cst_5 : f32 to vector<8x32xf32>
    %20 = arith.select %18, %16, %19 : vector<8x32xi1>, vector<8x32xf32>
    %c0_6 = arith.constant 0 : index
    %c0_7 = arith.constant 0 : index
    %21 = vector.load %arg4[%c0_6, %c0_7] : memref<8x1xi32, #tpu.memory_space<vmem>>, vector<8x1xi32>
    %c0_i32_8 = arith.constant 0 : i32
    %22 = vector.broadcast %c0_i32_8 : i32 to vector<8x1xi32>
    %23 = arith.select %10, %21, %22 : vector<8x1xi1>, vector<8x1xi32>
    %24 = tpu.iota {dimensions = array<i32: 1>} : vector<8x32xi32>
    %25 = vector.broadcast %23 : vector<8x1xi32> to vector<8x32xi32>
    %26 = arith.cmpi eq, %24, %25 : vector<8x32xi32>
    %cst_9 = arith.constant dense<0xFF800000> : vector<8xf32>
    %27 = vector.multi_reduction <maximumf>, %15, %cst_9 [1] : vector<8x32xf32> to vector<8xf32>
    %28 = vector.shape_cast %27 : vector<8xf32> to vector<8x1xf32>
    %cst_10 = arith.constant dense<0xFF800000> : vector<8xf32>
    %29 = vector.multi_reduction <maximumf>, %20, %cst_10 [1] : vector<8x32xf32> to vector<8xf32>
    %30 = vector.shape_cast %29 : vector<8xf32> to vector<8x1xf32>
    %31 = vector.broadcast %28 : vector<8x1xf32> to vector<8x32xf32>
    %32 = arith.subf %15, %31 : vector<8x32xf32>
    %cst_11 = arith.constant 2.500000e-01 : f32
    %33 = vector.broadcast %cst_11 : f32 to vector<8x32xf32>
    %34 = arith.mulf %32, %33 : vector<8x32xf32>
    %35 = vector.broadcast %30 : vector<8x1xf32> to vector<8x32xf32>
    %36 = arith.subf %20, %35 : vector<8x32xf32>
    %cst_12 = arith.constant 2.500000e-01 : f32
    %37 = vector.broadcast %cst_12 : f32 to vector<8x32xf32>
    %38 = arith.mulf %36, %37 : vector<8x32xf32>
    %39 = math.exp %34 : vector<8x32xf32>
    %40 = math.exp %38 : vector<8x32xf32>
    %cst_13 = arith.constant 0.000000e+00 : f32
    %41 = vector.broadcast %cst_13 : f32 to vector<8x32xf32>
    %42 = arith.select %26, %39, %41 : vector<8x32xi1>, vector<8x32xf32>
    %cst_14 = arith.constant dense<0.000000e+00> : vector<8xf32>
    %43 = vector.multi_reduction <add>, %42, %cst_14 [1] : vector<8x32xf32> to vector<8xf32>
    %44 = vector.shape_cast %43 : vector<8xf32> to vector<8x1xf32>
    %cst_15 = arith.constant 0.000000e+00 : f32
    %45 = vector.broadcast %cst_15 : f32 to vector<8x32xf32>
    %46 = arith.select %26, %40, %45 : vector<8x32xi1>, vector<8x32xf32>
    %cst_16 = arith.constant dense<0.000000e+00> : vector<8xf32>
    %47 = vector.multi_reduction <add>, %46, %cst_16 [1] : vector<8x32xf32> to vector<8xf32>
    %48 = vector.shape_cast %47 : vector<8xf32> to vector<8x1xf32>
    %cst_17 = arith.constant 0.000000e+00 : f32
    %49 = vector.broadcast %cst_17 : f32 to vector<8x32xf32>
    %50 = arith.select %26, %49, %39 : vector<8x32xi1>, vector<8x32xf32>
    %cst_18 = arith.constant dense<0.000000e+00> : vector<8xf32>
    %51 = vector.multi_reduction <add>, %50, %cst_18 [1] : vector<8x32xf32> to vector<8xf32>
    %52 = vector.shape_cast %51 : vector<8xf32> to vector<8x1xf32>
    %cst_19 = arith.constant 0.000000e+00 : f32
    %53 = vector.broadcast %cst_19 : f32 to vector<8x32xf32>
    %54 = arith.select %26, %53, %40 : vector<8x32xi1>, vector<8x32xf32>
    %cst_20 = arith.constant dense<0.000000e+00> : vector<8xf32>
    %55 = vector.multi_reduction <add>, %54, %cst_20 [1] : vector<8x32xf32> to vector<8xf32>
    %56 = vector.shape_cast %55 : vector<8xf32> to vector<8x1xf32>
    %57 = arith.addf %52, %44 : vector<8x1xf32>
    %58 = arith.addf %56, %48 : vector<8x1xf32>
    %59 = arith.divf %44, %57 : vector<8x1xf32>
    %60 = arith.divf %48, %58 : vector<8x1xf32>
    %61 = arith.divf %52, %57 : vector<8x1xf32>
    %62 = arith.divf %56, %58 : vector<8x1xf32>
    %63 = math.log %60 : vector<8x1xf32>
    %64 = math.log %59 : vector<8x1xf32>
    %65 = arith.subf %63, %64 : vector<8x1xf32>
    %66 = arith.mulf %60, %65 : vector<8x1xf32>
    %67 = math.log %62 : vector<8x1xf32>
    %68 = math.log %61 : vector<8x1xf32>
    %69 = arith.subf %67, %68 : vector<8x1xf32>
    %70 = arith.mulf %62, %69 : vector<8x1xf32>
    %71 = arith.addf %66, %70 : vector<8x1xf32>
    %72 = arith.subf %38, %34 : vector<8x32xf32>
    %73 = arith.mulf %40, %72 : vector<8x32xf32>
    %cst_21 = arith.constant 0.000000e+00 : f32
    %74 = vector.broadcast %cst_21 : f32 to vector<8x32xf32>
    %75 = arith.select %26, %74, %73 : vector<8x32xi1>, vector<8x32xf32>
    %cst_22 = arith.constant dense<0.000000e+00> : vector<8xf32>
    %76 = vector.multi_reduction <add>, %75, %cst_22 [1] : vector<8x32xf32> to vector<8xf32>
    %77 = vector.shape_cast %76 : vector<8xf32> to vector<8x1xf32>
    %78 = arith.divf %77, %56 : vector<8x1xf32>
    %79 = math.log %52 : vector<8x1xf32>
    %80 = math.log %56 : vector<8x1xf32>
    %81 = arith.subf %79, %80 : vector<8x1xf32>
    %82 = arith.addf %78, %81 : vector<8x1xf32>
    %cst_23 = arith.constant 0.000000e+00 : f32
    %83 = vector.broadcast %cst_23 : f32 to vector<8x1xf32>
    %84 = arith.select %10, %71, %83 : vector<8x1xi1>, vector<8x1xf32>
    %85 = vector.shape_cast %84 : vector<8x1xf32> to vector<1x8x1xf32>
    %cst_24 = arith.constant dense<0.000000e+00> : vector<1xf32>
    %86 = vector.multi_reduction <add>, %85, %cst_24 [1, 2] : vector<1x8x1xf32> to vector<1xf32>
    %87 = vector.shape_cast %86 : vector<1xf32> to vector<1x1x1xf32>
    %88 = vector.extract %87[0, 0, 0] : f32 from vector<1x1x1xf32>
    %cst_25 = arith.constant 5.000000e-01 : f32
    %89 = arith.mulf %cst_25, %88 : f32
    %cst_26 = arith.constant 0.000000e+00 : f32
    %90 = vector.broadcast %cst_26 : f32 to vector<8x1xf32>
    %91 = arith.select %10, %82, %90 : vector<8x1xi1>, vector<8x1xf32>
    %92 = vector.shape_cast %91 : vector<8x1xf32> to vector<1x8x1xf32>
    %cst_27 = arith.constant dense<0.000000e+00> : vector<1xf32>
    %93 = vector.multi_reduction <add>, %92, %cst_27 [1, 2] : vector<1x8x1xf32> to vector<1xf32>
    %94 = vector.shape_cast %93 : vector<1xf32> to vector<1x1x1xf32>
    %95 = vector.extract %94[0, 0, 0] : f32 from vector<1x1x1xf32>
    %cst_28 = arith.constant 1.000000e+00 : f32
    %96 = arith.mulf %cst_28, %95 : f32
    %97 = arith.addf %89, %96 : f32
    %c0_29 = arith.constant 0 : index
    %c0_30 = arith.constant 0 : index
    %98 = vector.load %arg5[%c0_29, %c0_30] : memref<1x128xf32, #tpu.memory_space<vmem>>, vector<1x128xf32>
    %99 = vector.broadcast %97 : f32 to vector<1x128xf32>
    %100 = arith.addf %98, %99 : vector<1x128xf32>
    %c0_31 = arith.constant 0 : index
    %c0_32 = arith.constant 0 : index
    %101 = vector.load %arg5[%c0_31, %c0_32] : memref<1x128xf32, #tpu.memory_space<vmem>>, vector<1x128xf32>
    tpu.vector_store %arg5[%c0_31, %c0_32], %100 {strides = array<i32>} : memref<1x128xf32, #tpu.memory_space<vmem>>, vector<1x128xf32>,
    return
  }
  func.func @transform_0(%arg0: i32, %arg1: i32) -> (i32, i32) {
    %c1_i32 = arith.constant 1 : i32
    %0 = arith.muli %arg0, %c1_i32 : i32
    %1 = arith.addi %0, %arg1 : i32
    %c0_i32 = arith.constant 0 : i32
    %2 = arith.minsi %1, %c0_i32 : i32
    %c0_i32_0 = arith.constant 0 : i32
    %c0_i32_1 = arith.constant 0 : i32
    return %2, %c0_i32_0 : i32, i32
  }
  func.func @transform_1(%arg0: i32, %arg1: i32) -> (i32, i32) {
    %c1_i32 = arith.constant 1 : i32
    %0 = arith.muli %arg0, %c1_i32 : i32
    %1 = arith.addi %0, %arg1 : i32
    %c0_i32 = arith.constant 0 : i32
    %2 = arith.minsi %1, %c0_i32 : i32
    %c0_i32_0 = arith.constant 0 : i32
    %c0_i32_1 = arith.constant 0 : i32
    return %2, %c0_i32_0 : i32, i32
  }
  func.func @transform_2(%arg0: i32, %arg1: i32) -> (i32, i32) {
    %c1_i32 = arith.constant 1 : i32
    %0 = arith.muli %arg0, %c1_i32 : i32
    %1 = arith.addi %0, %arg1 : i32
    %c0_i32 = arith.constant 0 : i32
    %2 = arith.minsi %1, %c0_i32 : i32
    %c0_i32_0 = arith.constant 0 : i32
    %c0_i32_1 = arith.constant 0 : i32
    return %2, %c0_i32_0 : i32, i32
  }
  func.func @transform_3(%arg0: i32, %arg1: i32) -> (i32, i32) {
    %c0_i32 = arith.constant 0 : i32
    %c0_i32_0 = arith.constant 0 : i32
    return %c0_i32, %arg0 : i32, i32
  }
}

</mosaic_0001>

<bundles_post_ra>
// kernel: tpu_custom_call.1
= control target key start
LH: loop header
LB: loop body
LE: loop exit
PB: predicated region body
PF: predicated region fallthrough
CT: control target
= control target key end

     0   :  { %8 = vsyncpa [#allocation3], 0  ;;  %s372_s0 = inlined_call_operand.vmem [shape: f32[8,32], index: 0, kind: input, shape index: {}]   ;;  %s373_s1 = inlined_call_operand.hbm [shape: f32[8,32], index: 1, kind: input, shape index: {}]   ;;  %s374_s2 = inlined_call_operand.vmem [shape: s32[8,1], index: 2, kind: input, shape index: {}]   ;;  %s375_s3 = inlined_call_operand.hbm [shape: f32[1,128], index: 3, kind: output, shape index: {}]  }
   0x1   :  { %9 = vsyncpa [#allocation4], 0  ;;  %s315_s12 = smov [#allocation2]  }
   0x2   :  { %s33_s13 = sshll.u32 %s315_s12, 4  ;;  %s34_s13 = int_to_ptr.vmem [resolvable:$true] %s33_s13 }
   0x3   :  { %s279_s14 = scalar_lea.vmem %s34_s13, 128  ;;  %p284_p1 = scmp.lt.s32.totalorder %s34_s13, %s34_s13 }
   0x4   :  { %p280_p0 = scmp.ne.s32.totalorder %s34_s13, %s279_s14  ;;  %p285_p2 = scmp.lt.s32.totalorder %s279_s14, %s279_s14 }
   0x6   :  { %p286_p3 = por %p285_p2, %p284_p1 }
   0x8   :  { %p287_p4 = pnand %p286_p3, %p280_p0 }
   0xa   :  { %290 = shalt.err (!%p287_p4)
}
   0xb   :  { %36 = dma.hbm_to_vmem [thread:$0]  %s373_s1, 128, %s34_s13, [#allocation3]  }
   0xc   :  { %311 = dma.done.wait [#allocation3], 128  }
   0xd   :  { %312 = vsyncadd [#allocation3], 4294967168  ;;  %v316_v0 = vmov 0.0   ;;  %v317_v1 = vmov 0   ;;  %vm115_vm0 = vcmask 261120   ;;  %v101_v2 = vld [vmem:[%s372_s0] sm:$0xff]  ;;  %v109_v15 = vlaneseq }
   0xe   :  { %93 = vst [vmem:[#allocation5] sm:$0x1] %v316_v0  ;;  %247 = vset.pattern.permute.xlu1 %v317_v1  ;;  %248 = vset.pattern.permute.xlu0 %v317_v1  ;;  %v105_v3 = vld [vmem:[#allocation2] sm:$0xff]  ;;  %v116_v5 = vsel %vm115_vm0, %v101_v2, -inf  ;;  %vm182_vm2 = vcmask 7168   ;;  %s318_s22 = smov [#allocation5]  }
   0xf   :  { %v107_v4 = vld [vmem:[%s374_s2] sm:$0xff]  ;;  %117 = vmax.xlane.f32.xlu0 %v116_v5  ;;  %v119_v6 = vsel %vm115_vm0, %v105_v3, -inf  ;;  %v110_v16 = vand.u32 127, %v109_v15  ;;  %s216_s23 = sshll.u32 %s318_s22, 4  ;;  %s217_s23 = int_to_ptr.vmem [resolvable:$true] %s216_s23 }
  0x10   :  { %112 = vperm.xlu1 %247, %v107_v4   ;;  %s291_s24 = scalar_lea.vmem %s217_s23, 16  ;;  %s295_s25 = scalar_lea.vmem %s217_s23, 32 }
  0x11   :  { %p292_p5 = scmp.ne.s32.totalorder %s217_s23, %s291_s24  ;;  %p296_p6 = scmp.lt.s32.totalorder %s217_s23, %s217_s23 }
  0x12   :  { %p297_p7 = scmp.lt.s32.totalorder %s295_s25, %s291_s24 }
  0x13   :  { %120 = vmax.xlane.f32.xlu0 %v119_v6 }
  0x14   :  { %p298_p8 = por %p297_p7, %p296_p6 }
  0x16   :  { %p299_p9 = pnand %p298_p8, %p292_p5 }
  0x8b   :  { %v113_v17 = vpop.permute.xlu1 %112 }
  0x8c   :  { %vm350_vm1 = vcmp.eq.s32.totalorder %v110_v16, %v113_v17 }
  0x98   :  { %v118_v7 = vpop.xlane.xlu0 %117 }
  0x99   :  { %v122_v8 = vsub.f32 %v101_v2, %v118_v7 }
  0x9b   :  { %v123_v9 = vmul.f32 0.25, %v122_v8 }
  0x9c   :  { %v121_v10 = vpop.xlane.xlu0 %120 }
  0x9d   :  { %v126_v11 = vmul.f32 1.442695, %v123_v9  ;;  %v124_v12 = vsub.f32 %v105_v3, %v121_v10 }
  0x9f   :  { %249 = vpow2.f32 %v126_v11  ;;  %v125_v13 = vmul.f32 0.25, %v124_v12 }
  0xa1   :  { %v128_v14 = vmul.f32 1.442695, %v125_v13  ;;  %v167_v26 = vsub.f32 %v125_v13, %v123_v9 }
  0xa3   :  { %251 = vpow2.f32 %v128_v14 }
  0xac   :  { %v250_v19 = vpop.eup %249 }
  0xad   :  { %v130_v20 = vsel %vm350_vm1, %v250_v19, 0.0  ;;  %v138_v25 = vsel %vm350_vm1, 0.0, %v250_v19  ;;  %v206_v19 = vld [vmem:[#allocation5] sm:$0x1] }
  0xae   :  { %v131_v21 = vsel %vm115_vm0, %v130_v20, 0.0  ;;  %v139_v27 = vsel %vm115_vm0, %v138_v25, 0.0 }
  0xaf   :  { %132 = vadd.xlane.f32.xlu1 %v131_v21 }
  0xb0   :  { %v252_v22 = vpop.eup %251 }
  0xb1   :  { %v134_v23 = vsel %vm350_vm1, %v252_v22, 0.0  ;;  %v142_v28 = vsel %vm350_vm1, 0.0, %v252_v22  ;;  %v168_v29 = vmul.f32 %v252_v22, %v167_v26 }
  0xb2   :  { %v135_v24 = vsel %vm115_vm0, %v134_v23, 0.0  ;;  %v143_v30 = vsel %vm115_vm0, %v142_v28, 0.0 }
  0xb3   :  { %136 = vadd.xlane.f32.xlu0 %v135_v24  ;;  %v169_v31 = vsel %vm350_vm1, 0.0, %v168_v29 }
  0xb4   :  { %v170_v32 = vsel %vm115_vm0, %v169_v31, 0.0 }
  0xb7   :  { %140 = vadd.xlane.f32.xlu0 %v139_v27 }
  0xbb   :  { %144 = vadd.xlane.f32.xlu0 %v143_v30 }
  0xbf   :  { %171 = vadd.xlane.f32.xlu0 %v170_v32 }
 0x138   :  { %v133_v34 = vpop.xlane.xlu1 %132 }
 0x13c   :  { %v137_v33 = vpop.xlane.xlu0 %136 }
 0x140   :  { %v141_v35 = vpop.xlane.xlu0 %140 }
 0x141   :  { %v146_v36 = vadd.f32 %v141_v35, %v133_v34 }
 0x143   :  { %253 = vrcp.f32 %v146_v36 }
 0x144   :  { %v145_v37 = vpop.xlane.xlu0 %144 }
 0x145   :  { %v147_v38 = vadd.f32 %v145_v37, %v137_v33 }
 0x147   :  { %255 = vrcp.f32 %v147_v38 }
 0x148   :  { %257 = vlog2.f32 %v141_v35  ;;  %v172_v63 = vpop.xlane.xlu0 %171 }
 0x149   :  { %259 = vlog2.f32 %v145_v37 }
 0x150   :  { %v254_v39 = vpop.eup %253 }
 0x151   :  { %v152_v40 = vmul.f32 %v254_v39, %v141_v35  ;;  %v149_v41 = vmul.f32 %v254_v39, %v133_v34 }
 0x153   :  { %261 = vlog2.f32 %v152_v40 }
 0x154   :  { %v256_v42 = vpop.eup %255  ;;  %263 = vlog2.f32 %v149_v41 }
 0x155   :  { %v153_v43 = vmul.f32 %v256_v42, %v145_v37  ;;  %v151_v44 = vmul.f32 %v256_v42, %v137_v33  ;;  %v258_v45 = vpop.eup %257 }
 0x156   :  { %v260_v46 = vpop.eup %259  ;;  %v176_v58 = vmul.f32 0.6931472, %v258_v45 }
 0x157   :  { %265 = vlog2.f32 %v153_v43  ;;  %v178_v55 = vmul.f32 0.6931472, %v260_v46 }
 0x158   :  { %267 = vlog2.f32 %v151_v44 }
 0x159   :  { %269 = vrcp.f32 %v145_v37  ;;  %v179_v62 = vsub.f32 %v176_v58, %v178_v55 }
 0x160   :  { %v262_v47 = vpop.eup %261 }
 0x161   :  { %v264_v48 = vpop.eup %263  ;;  %v163_v51 = vmul.f32 0.6931472, %v262_v47 }
 0x162   :  { %v157_v54 = vmul.f32 0.6931472, %v264_v48 }
 0x164   :  { %v266_v49 = vpop.eup %265 }
 0x165   :  { %v268_v50 = vpop.eup %267  ;;  %v161_v52 = vmul.f32 0.6931472, %v266_v49 }
 0x166   :  { %v155_v53 = vmul.f32 0.6931472, %v268_v50  ;;  %v270_v59 = vpop.eup %269 }
 0x167   :  { %v164_v56 = vsub.f32 %v161_v52, %v163_v51  ;;  %v174_v0 = vmul.f32 %v270_v59, %v172_v63 }
 0x168   :  { %v158_v57 = vsub.f32 %v155_v53, %v157_v54 }
 0x169   :  { %v165_v60 = vmul.f32 %v164_v56, %v153_v43  ;;  %v180_v3 = vadd.f32 %v179_v62, %v174_v0 }
 0x16a   :  { %v159_v61 = vmul.f32 %v158_v57, %v151_v44 }
 0x16b   :  { %v195_v4 = vsel %vm182_vm2, %v180_v3, 0.0 }
 0x16c   :  { %v166_v1 = vadd.f32 %v165_v60, %v159_v61 }
 0x16e   :  { %v183_v2 = vsel %vm182_vm2, %v166_v1, 0.0 }
 0x16f   :  { %184 = vadd.xlane.f32.xlu0 %v183_v2 }
 0x173   :  { %196 = vadd.xlane.f32.xlu0 %v195_v4 }
 0x1f8   :  { %v185_v5 = vpop.xlane.xlu0 %184 }
 0x1f9   :  { %v186_v6 = vrot.slane %v185_v5, 4 }
 0x1fb   :  { %v187_v7 = vadd.f32 %v186_v6, %v185_v5 }
 0x1fc   :  { %v197_v8 = vpop.xlane.xlu0 %196 }
 0x1fd   :  { %v188_v9 = vrot.slane %v187_v7, 2  ;;  %v198_v10 = vrot.slane %v197_v8, 4 }
 0x1ff   :  { %v199_v11 = vadd.f32 %v198_v10, %v197_v8  ;;  %v189_v12 = vadd.f32 %v188_v9, %v187_v7 }
 0x201   :  { %v200_v13 = vrot.slane %v199_v11, 2  ;;  %v190_v14 = vrot.slane %v189_v12, 1 }
 0x203   :  { %v201_v15 = vadd.f32 %v200_v13, %v199_v11  ;;  %v191_v16 = vadd.f32 %v190_v14, %v189_v12 }
 0x205   :  { %239 = vpush %v191_v16  ;;  %v202_v17 = vrot.slane %v201_v15, 1 }
 0x207   :  { %v203_v18 = vadd.f32 %v202_v17, %v201_v15 }
 0x209   :  { %241 = vpush %v203_v18 }
 0x236   :  { %s240_s0 = spop %239 }
 0x237   :  { %s193_s1 = smul.f32 0.5, %s240_s0 }
 0x23a   :  { %s242_s2 = spop %241 }
 0x23b   :  { %s205_s21 = sadd.f32 %s242_s2, %s193_s1 }
 0x23d   :  { %v207_v20 = vstv %s205_s21 }
 0x23e   :  { %v208_v21 = vadd.f32 %v207_v20, %v206_v19 }
 0x240   :  { %209 = vst [vmem:[#allocation5] sm:$0x1] %v208_v21 }
 0x241   :  { %302 = shalt.err (!%p299_p9)
}
 0x242   :  { %219 = dma.vmem_to_hbm [thread:$0]  %s217_s23, 16, %s375_s3, [#allocation4]  }
 0x243   :  { %313 = dma.done.wait [#allocation4], 16  }
 0x244   :  { %314 = vsyncadd [#allocation4], 4294967280 }
 0x245   :  { %223 = vsyncpa [#allocation3], 1 }
 0x246   :  { %224 = vsyncpa [#allocation4], 1 }

</bundles_post_ra>
